<compile_context>
chip_gen: v5e
topology: v5e:2x2
jax: 0.10.0
libtpu: 0.0.40
codegen_flags: <defaults>
</compile_context>

<pallas_src>
import jax
import jax.numpy as jnp
from jax.experimental import pallas as pl
from jax.experimental.pallas import tpu as pltpu

KH = KW = 3  # conv kernel size


def conv_leaky_kernel(w_ref, p_ref, o_ref):
    # w_ref: (Cout, Kp)     flattened conv weights + bias column (K padded to Kp)
    # p_ref: (N, Kp, HW)    per-batch im2col patches; row K is all-ones (bias row)
    # o_ref: (N, Cout, HW)  lane-dense output (HW is a multiple of 128)
    w = w_ref[...]
    n_batch = p_ref.shape[0]
    for n in range(n_batch):  # static unroll over tiny batch (N=2)
        acc = jnp.dot(w, p_ref[n], preferred_element_type=jnp.float32)
        o_ref[n] = jnp.where(acc > 0, acc, acc * 3.0).astype(o_ref.dtype)


def model4_forward(x_nchw, w_oihw, bias):
    """Conv2d(3->8, k=3, s=1, p=1) + where(v>0, v, 3v). NCHW in / NCHW out."""
    N, Cin, H, W = x_nchw.shape
    Cout = w_oihw.shape[0]
    HW = H * W
    K = Cin * KH * KW                       # 27
    Kp = ((K + 1 + 7) // 8) * 8             # 27 (+1 bias row) -> 32 (sublane multiple)

    # ---- wrapper glue (plain JAX, fused by XLA): pad + batch-major im2col ----
    x_pad = jnp.pad(x_nchw, ((0, 0), (0, 0), (1, 1), (1, 1)))      # (N, Cin, H+2, W+2)
    shifted = [x_pad[:, :, kh:kh + H, kw:kw + W]                   # each (N, Cin, H, W)
               for kh in range(KH) for kw in range(KW)]
    patches = jnp.stack(shifted, axis=2).reshape(N, K, HW)         # (N, 27, 256)
    ones_row = jnp.ones((N, 1, HW), patches.dtype)                 # bias row
    zero_rows = jnp.zeros((N, Kp - K - 1, HW), patches.dtype)
    patches = jnp.concatenate([patches, ones_row, zero_rows], 1)   # (N, Kp, HW)

    # weights: (Cout, K) ++ bias column ++ zero padding -> (Cout, Kp)
    w2 = jnp.concatenate(
        [w_oihw.reshape(Cout, K),
         bias.reshape(Cout, 1),
         jnp.zeros((Cout, Kp - K - 1), w_oihw.dtype)], axis=1)

    out = pl.pallas_call(
        conv_leaky_kernel,
        out_shape=jax.ShapeDtypeStruct((N, Cout, HW), jnp.float32),
        in_specs=[
            pl.BlockSpec(memory_space=pltpu.MemorySpace.VMEM),     # whole weight in VMEM
            pl.BlockSpec(memory_space=pltpu.MemorySpace.VMEM),     # whole patch tensor
        ],
        out_specs=pl.BlockSpec(memory_space=pltpu.MemorySpace.VMEM),
    )(w2, patches)

    # (N, Cout, HW) -> (N, Cout, H, W): pure reshape, no transpose / HBM copy.
    return out.reshape(N, Cout, H, W)


if __name__ == "__main__":
    key = jax.random.PRNGKey(0)
    kx, kw, kb = jax.random.split(key, 3)

    N, Cin, H, W, Cout = 2, 3, 16, 16, 8

    # Deterministic parameter init (PyTorch-style uniform bound 1/sqrt(fan_in)).
    fan_in = Cin * KH * KW
    bound = 1.0 / (fan_in ** 0.5)
    w = jax.random.uniform(kw, (Cout, Cin, KH, KW), jnp.float32, -bound, bound)
    b = jax.random.uniform(kb, (Cout,), jnp.float32, -bound, bound)
    x = jax.random.normal(kx, (N, Cin, H, W), jnp.float32)

    fwd = jax.jit(model4_forward)
    out = jax.block_until_ready(fwd(x, w, b))

    # Cross-check against a plain-JAX reference of the same forward pass.
    ref_conv = jax.lax.conv_general_dilated(
        x, w, window_strides=(1, 1), padding=((1, 1), (1, 1)),
        dimension_numbers=("NCHW", "OIHW", "NCHW"))
    ref_conv = ref_conv + b.reshape(1, Cout, 1, 1)
    ref = jnp.where(ref_conv > 0, ref_conv, ref_conv * 3.0)

    assert out.shape == (N, Cout, H, W)
    assert jnp.allclose(out, ref, atol=1e-4, rtol=1e-4), "mismatch vs reference"
    print("KERNEL_OK")
</pallas_src>

<mosaic_0001>
module attributes {stable_mosaic.version = 11 : i64} {
  func.func @conv_leaky_kernel(%arg0: memref<8x32xf32, #tpu.memory_space<vmem>>, %arg1: memref<2x32x256xf32, #tpu.memory_space<vmem>>, %arg2: memref<2x8x256xf32, #tpu.memory_space<vmem>>) attributes {dimension_semantics = [], scalar_prefetch = 0 : i64, scratch_operands = 0 : i64, tpu.core_type = #tpu.core_type<tc>} {
    %c0 = arith.constant 0 : index
    %c0_0 = arith.constant 0 : index
    %0 = vector.load %arg0[%c0, %c0_0] : memref<8x32xf32, #tpu.memory_space<vmem>>, vector<8x32xf32>
    %c0_1 = arith.constant 0 : index
    %c0_2 = arith.constant 0 : index
    %c0_3 = arith.constant 0 : index
    %1 = vector.load %arg1[%c0_1, %c0_2, %c0_3] : memref<2x32x256xf32, #tpu.memory_space<vmem>>, vector<1x32x256xf32>
    %2 = vector.shape_cast %1 : vector<1x32x256xf32> to vector<32x256xf32>
    %cst = arith.constant dense<0.000000e+00> : vector<8x256xf32>
    %3 = tpu.matmul %0, %2, %cst {dimension_numbers = #tpu.dot_dimension_numbers<[1], [0], [0], [1], [0, 0, 1, 1], [], []>} : vector<8x32xf32>, vector<32x256xf32>, vector<8x256xf32> -> vector<8x256xf32>
    %cst_4 = arith.constant 0.000000e+00 : f32
    %4 = vector.broadcast %cst_4 : f32 to vector<8x256xf32>
    %5 = arith.cmpf ogt, %3, %4 : vector<8x256xf32>
    %cst_5 = arith.constant 3.000000e+00 : f32
    %6 = vector.broadcast %cst_5 : f32 to vector<8x256xf32>
    %7 = arith.mulf %3, %6 : vector<8x256xf32>
    %8 = arith.select %5, %3, %7 : vector<8x256xi1>, vector<8x256xf32>
    %c0_6 = arith.constant 0 : index
    %c0_7 = arith.constant 0 : index
    %c0_8 = arith.constant 0 : index
    %9 = vector.load %arg2[%c0_6, %c0_7, %c0_8] : memref<2x8x256xf32, #tpu.memory_space<vmem>>, vector<1x8x256xf32>
    %10 = vector.shape_cast %9 : vector<1x8x256xf32> to vector<8x256xf32>
    %11 = vector.shape_cast %8 : vector<8x256xf32> to vector<1x8x256xf32>
    tpu.vector_store %arg2[%c0_6, %c0_7, %c0_8], %11 {strides = array<i32>} : memref<2x8x256xf32, #tpu.memory_space<vmem>>, vector<1x8x256xf32>,
    %c1 = arith.constant 1 : index
    %c0_9 = arith.constant 0 : index
    %c0_10 = arith.constant 0 : index
    %12 = vector.load %arg1[%c1, %c0_9, %c0_10] : memref<2x32x256xf32, #tpu.memory_space<vmem>>, vector<1x32x256xf32>
    %13 = vector.shape_cast %12 : vector<1x32x256xf32> to vector<32x256xf32>
    %cst_11 = arith.constant dense<0.000000e+00> : vector<8x256xf32>
    %14 = tpu.matmul %0, %13, %cst_11 {dimension_numbers = #tpu.dot_dimension_numbers<[1], [0], [0], [1], [0, 0, 1, 1], [], []>} : vector<8x32xf32>, vector<32x256xf32>, vector<8x256xf32> -> vector<8x256xf32>
    %cst_12 = arith.constant 0.000000e+00 : f32
    %15 = vector.broadcast %cst_12 : f32 to vector<8x256xf32>
    %16 = arith.cmpf ogt, %14, %15 : vector<8x256xf32>
    %cst_13 = arith.constant 3.000000e+00 : f32
    %17 = vector.broadcast %cst_13 : f32 to vector<8x256xf32>
    %18 = arith.mulf %14, %17 : vector<8x256xf32>
    %19 = arith.select %16, %14, %18 : vector<8x256xi1>, vector<8x256xf32>
    %c1_14 = arith.constant 1 : index
    %c0_15 = arith.constant 0 : index
    %c0_16 = arith.constant 0 : index
    %20 = vector.load %arg2[%c1_14, %c0_15, %c0_16] : memref<2x8x256xf32, #tpu.memory_space<vmem>>, vector<1x8x256xf32>
    %21 = vector.shape_cast %20 : vector<1x8x256xf32> to vector<8x256xf32>
    %22 = vector.shape_cast %19 : vector<8x256xf32> to vector<1x8x256xf32>
    tpu.vector_store %arg2[%c1_14, %c0_15, %c0_16], %22 {strides = array<i32>} : memref<2x8x256xf32, #tpu.memory_space<vmem>>, vector<1x8x256xf32>,
    return
  }
}

</mosaic_0001>

<bundles_post_ra>
// kernel: model4_forward.1
= control target key start
LH: loop header
LB: loop body
LE: loop exit
PB: predicated region body
PF: predicated region fallthrough
CT: control target
= control target key end

     0   :  { %vm20_vm0 = vcmask 261120   ;;  %s226_s1 = inlined_call_operand.vmem [shape: f32[2,32,256], index: 1, kind: input, shape index: {}]   ;;  %s227_s0 = inlined_call_operand.vmem [shape: f32[8,32], index: 0, kind: input, shape index: {}]   ;;  %s228_s2 = inlined_call_operand.vmem [shape: f32[2,8,256], index: 2, kind: output, shape index: {}]  }
   0x1   :  { %v142_v0 = vld [vmem:[%s226_s1 + $0x70] sm:$0xff]  ;;  %v143_v1 = vld [vmem:[%s226_s1 + $0x78] sm:$0xff]  ;;  %v140_v2 = vld [vmem:[%s226_s1 + $0x60] sm:$0xff] }
   0x2   :  { %93 = vmatpush.msra.mxu2 %v142_v0  ;;  %113 = vmatpush.msra.mxu3 %v143_v1  ;;  %v141_v3 = vld [vmem:[%s226_s1 + $0x68] sm:$0xff]  ;;  %v18_v4 = vld [vmem:[%s226_s1 + $0x30] sm:$0xff]  ;;  %v19_v5 = vld [vmem:[%s226_s1 + $0x38] sm:$0xff] }
   0x3   :  { %36 = vmatpush.msra.mxu0 %v18_v4  ;;  %56 = vmatpush.msra.mxu1 %v19_v5  ;;  %v138_v6 = vld [vmem:[%s226_s1 + $0x50] sm:$0xff]  ;;  %v139_v7 = vld [vmem:[%s226_s1 + $0x58] sm:$0xff]  ;;  %v16_v8 = vld [vmem:[%s226_s1 + $0x20] sm:$0xff] }
   0x4   :  { %94 = vmatpush.msra.mxu2 %v140_v2  ;;  %114 = vmatpush.msra.mxu3 %v141_v3  ;;  %v17_v9 = vld [vmem:[%s226_s1 + $0x28] sm:$0xff]  ;;  %v136_v10 = vld [vmem:[%s226_s1 + $0x40] sm:$0xff]  ;;  %v14_v12 = vld [vmem:[%s226_s1 + $0x10] sm:$0xff] }
   0x5   :  { %37 = vmatpush.msra.mxu0 %v16_v8  ;;  %57 = vmatpush.msra.mxu1 %v17_v9  ;;  %v137_v11 = vld [vmem:[%s226_s1 + $0x48] sm:$0xff]  ;;  %v15_v13 = vld [vmem:[%s226_s1 + $0x18] sm:$0xff]  ;;  %v11_v14 = vld [vmem:[%s227_s0] sm:$0xff] }
   0x6   :  { %95 = vmatpush.msra.mxu2 %v138_v6  ;;  %115 = vmatpush.msra.mxu3 %v139_v7  ;;  %v12_v15 = vld [vmem:[%s226_s1] sm:$0xff]  ;;  %v13_v16 = vld [vmem:[%s226_s1 + $0x8] sm:$0xff] }
   0x7   :  { %38 = vmatpush.msra.mxu0 %v14_v12  ;;  %58 = vmatpush.msra.mxu1 %v15_v13 }
   0x8   :  { %96 = vmatpush.msra.mxu2 %v136_v10  ;;  %116 = vmatpush.msra.mxu3 %v137_v11 }
   0x9   :  { %144 = vmatmul.msk.f32.vlgmr.msra.gmra.mxu2 %vm20_vm0, %v11_v14  ;;  %145 = vmatmul.msk.f32.vlgmr.msra.gmra.mxu3 %vm20_vm0, %v11_v14 }
   0xa   :  { %39 = vmatpush.msra.mxu0 %v12_v15  ;;  %59 = vmatpush.msra.mxu1 %v13_v16 }
   0xb   :  { %134 = vmatmul.msk.f32.vlgmr.msra.gmra.mxu0 %vm20_vm0, %v11_v14  ;;  %135 = vmatmul.msk.f32.vlgmr.msra.gmra.mxu1 %vm20_vm0, %v11_v14 }
  0x88   :  { %v41_v17 = vpop.f32.mrf.mxu0  ;;  %v61_v18 = vpop.f32.mrf.mxu1 }
  0x89   :  { %vm64_vm1 = vcmp.gt.f32.partialorder %v41_v17, 0.0  ;;  %v66_v19 = vmul.f32 3.0, %v41_v17  ;;  %vm65_vm2 = vcmp.gt.f32.partialorder %v61_v18, 0.0  ;;  %v67_v20 = vmul.f32 3.0, %v61_v18 }
  0x8b   :  { %v68_v21 = vsel %vm64_vm1, %v41_v17, %v66_v19  ;;  %v69_v22 = vsel %vm65_vm2, %v61_v18, %v67_v20 }
  0x8c   :  { %70 = vst [vmem:[%s228_s2] sm:$0xff] %v68_v21  ;;  %v98_v23 = vpop.f32.mrf.mxu2  ;;  %v118_v24 = vpop.f32.mrf.mxu3 }
  0x8d   :  { %71 = vst [vmem:[%s228_s2 + $0x8] sm:$0xff] %v69_v22  ;;  %vm121_vm3 = vcmp.gt.f32.partialorder %v98_v23, 0.0  ;;  %v123_v25 = vmul.f32 3.0, %v98_v23  ;;  %vm122_vm4 = vcmp.gt.f32.partialorder %v118_v24, 0.0  ;;  %v124_v26 = vmul.f32 3.0, %v118_v24 }
  0x8f   :  { %v125_v27 = vsel %vm121_vm3, %v98_v23, %v123_v25  ;;  %v126_v28 = vsel %vm122_vm4, %v118_v24, %v124_v26 }
  0x90   :  { %146 = vst [vmem:[%s228_s2 + $0x10] sm:$0xff] %v125_v27 }
  0x91   :  { %147 = vst [vmem:[%s228_s2 + $0x18] sm:$0xff] %v126_v28 }

</bundles_post_ra>
